<compile_context>
chip_gen: v7x
topology: tpu7x:2x2x1
jax: 0.10.0
libtpu: 0.0.40
codegen_flags: <defaults>
</compile_context>

<pallas_src>
import functools

import jax
import jax.numpy as jnp
from jax import lax
from jax.experimental import pallas as pl
from jax.experimental.pallas import tpu as pltpu


def _round_up(x: int, m: int) -> int:
    return (x + m - 1) // m * m


def _vmem_capacity_bytes() -> int:
    try:
        return int(pltpu.get_tpu_info().vmem_capacity_bytes)
    except Exception:
        # Conservative fallback: v7x per-TensorCore VMEM.
        return 64 * 1024 * 1024


def _choose_row_tile(n: int, h_pad: int, itemsize: int) -> int:
    # Sublane packing alignment: f32 -> 8 rows, bf16 -> 16, int8/fp8 -> 32.
    row_align = max(8, 32 // max(itemsize, 1))
    vmem_cap = _vmem_capacity_bytes()
    # Double-buffered input + output tiles dominate VMEM; keep them under
    # ~60% of capacity so internal scratch / gamma / beta fit comfortably.
    budget = (vmem_cap * 3) // 5
    per_row_bytes = 4 * h_pad * itemsize  # 2 buffers x (in tile + out tile)
    row_tile = budget // per_row_bytes
    row_tile = max(row_align, min(1024, (row_tile // row_align) * row_align))
    # No point in a tile larger than the (alignment-rounded) problem.
    row_tile = min(row_tile, _round_up(n, row_align))
    return row_tile


def _layernorm_kernel(x_ref, g_ref, b_ref, o_ref, *, eps: float,
                      h_valid: int, h_pad: int):
    # x_ref: (row_tile, h_pad)   g_ref/b_ref: (1, h_pad)   o_ref: like x_ref
    x = x_ref[...].astype(jnp.float32)
    if h_valid != h_pad:
        # Hidden dim was padded up to a multiple of 128: mask padded lanes out
        # of the statistics (divide by the true hidden size).
        lane = lax.broadcasted_iota(jnp.int32, x.shape, dimension=1)
        valid = lane < h_valid
        x_m = jnp.where(valid, x, 0.0)
        mean = jnp.sum(x_m, axis=-1, keepdims=True) * (1.0 / h_valid)
        xc = jnp.where(valid, x - mean, 0.0)
    else:
        mean = jnp.mean(x, axis=-1, keepdims=True)
        xc = x - mean
    var = jnp.sum(xc * xc, axis=-1, keepdims=True) * (1.0 / h_valid)
    inv = lax.rsqrt(var + eps)
    y = xc * inv * g_ref[...].astype(jnp.float32) + b_ref[...].astype(jnp.float32)
    o_ref[...] = y.astype(o_ref.dtype)


def pallas_layernorm(x2d, gamma, beta, *, eps: float = 1e-5, row_tile=None):
    """LayerNorm over the last dim of x2d: (N, H). gamma/beta: (H,)."""
    n, h = x2d.shape
    dtype = x2d.dtype
    itemsize = jnp.dtype(dtype).itemsize

    # Lane-dense output: pad hidden to a multiple of 128.
    h_pad = max(128, _round_up(h, 128))
    if row_tile is None:
        row_tile = _choose_row_tile(n, h_pad, itemsize)
    n_pad = _round_up(n, row_tile)

    xp = x2d
    if h_pad != h or n_pad != n:
        xp = jnp.pad(x2d, ((0, n_pad - n), (0, h_pad - h)))
    g2 = jnp.pad(gamma.astype(jnp.float32), (0, h_pad - h)).reshape(1, h_pad)
    b2 = jnp.pad(beta.astype(jnp.float32), (0, h_pad - h)).reshape(1, h_pad)

    # Explicit scoped-VMEM limit: double-buffered x/o tiles + gamma/beta,
    # with ~30% headroom, clamped to physical capacity.
    tile_bytes = row_tile * h_pad * itemsize
    needed = 4 * tile_bytes + 4 * h_pad * 4
    vmem_cap = _vmem_capacity_bytes()
    vmem_bytes = min(max(int(needed * 1.3) + (2 << 20), 32 << 20),
                     int(vmem_cap * 0.9))

    kernel = functools.partial(_layernorm_kernel, eps=float(eps),
                               h_valid=h, h_pad=h_pad)
    out = pl.pallas_call(
        kernel,
        out_shape=jax.ShapeDtypeStruct((n_pad, h_pad), dtype),
        grid_spec=pl.GridSpec(
            grid=(n_pad // row_tile,),
            in_specs=[
                pl.BlockSpec((row_tile, h_pad), lambda i: (i, 0)),
                pl.BlockSpec((1, h_pad), lambda i: (0, 0)),   # gamma (resident)
                pl.BlockSpec((1, h_pad), lambda i: (0, 0)),   # beta  (resident)
            ],
            out_specs=pl.BlockSpec((row_tile, h_pad), lambda i: (i, 0)),
        ),
        compiler_params=pltpu.CompilerParams(
            dimension_semantics=("parallel",),   # shards rows across v7x's 2 TCs
            vmem_limit_bytes=vmem_bytes,
        ),
    )(xp, g2, b2)

    if h_pad != h or n_pad != n:
        out = out[:n, :h]
    return out


class NormLayerAdapter:
    """JAX/Pallas port of the PyTorch NormLayerAdapter (LN-tuning wrapper).

    base / tuning parameters are (gamma, beta) pairs for a LayerNorm over the
    last dim.  `tuning` starts as a deep copy of `base` (matching the PyTorch
    __init__).  `disabled` selects which parameter set the kernel uses.
    """

    def __init__(self, gamma, beta, eps: float = 1e-5):
        self.eps = float(eps)
        self.base_gamma = gamma
        self.base_beta = beta
        # deepcopy semantics: tuning layer starts identical to base layer.
        self.tuning_gamma = jnp.array(gamma)
        self.tuning_beta = jnp.array(beta)
        self.disabled = False
        # TODO(synk): requires_grad freezing, adapter_params() and
        # regenerate_tuning_layer() are training-framework bookkeeping with no
        # Pallas equivalent; only forward semantics are implemented here.

    def __call__(self, x):
        if self.disabled:
            g, b = self.base_gamma, self.base_beta
        else:
            g, b = self.tuning_gamma, self.tuning_beta
        orig_shape = x.shape
        h = orig_shape[-1]
        x2d = x.reshape(-1, h)
        y2d = pallas_layernorm(x2d, g, b, eps=self.eps)
        return y2d.reshape(orig_shape)


def _reference_layernorm(x, gamma, beta, eps=1e-5):
    xf = x.astype(jnp.float32)
    mean = jnp.mean(xf, axis=-1, keepdims=True)
    var = jnp.mean((xf - mean) ** 2, axis=-1, keepdims=True)
    y = (xf - mean) * lax.rsqrt(var + eps) * gamma + beta
    return y.astype(x.dtype)


if __name__ == "__main__":
    key = jax.random.PRNGKey(0)
    k_x, k_g, k_b, k_x2, k_g2, k_b2 = jax.random.split(key, 6)

    # --- small demo shape consistent with the module (batch, seq, hidden) ---
    batch, seq, hidden = 2, 8, 32
    x = jax.random.normal(k_x, (batch, seq, hidden), dtype=jnp.float32)
    gamma = 1.0 + 0.1 * jax.random.normal(k_g, (hidden,), dtype=jnp.float32)
    beta = 0.1 * jax.random.normal(k_b, (hidden,), dtype=jnp.float32)

    adapter = NormLayerAdapter(gamma, beta, eps=1e-5)

    # enabled path (tuning layer)
    y_tuning = adapter(x)
    jax.block_until_ready(y_tuning)

    # disabled path (base layer)
    adapter.disabled = True
    y_base = adapter(x)
    jax.block_until_ready(y_base)

    y_ref = _reference_layernorm(x, gamma, beta, eps=1e-5)
    assert jnp.allclose(y_tuning, y_ref, atol=1e-5, rtol=1e-5)
    assert jnp.allclose(y_base, y_ref, atol=1e-5, rtol=1e-5)

    # --- second small case exercising the lane-dense (H % 128 == 0) path ---
    hidden2 = 256
    x2 = jax.random.normal(k_x2, (batch, seq, hidden2), dtype=jnp.float32)
    gamma2 = 1.0 + 0.1 * jax.random.normal(k_g2, (hidden2,), dtype=jnp.float32)
    beta2 = 0.1 * jax.random.normal(k_b2, (hidden2,), dtype=jnp.float32)
    adapter2 = NormLayerAdapter(gamma2, beta2, eps=1e-5)
    y2 = adapter2(x2)
    jax.block_until_ready(y2)
    y2_ref = _reference_layernorm(x2, gamma2, beta2, eps=1e-5)
    assert jnp.allclose(y2, y2_ref, atol=1e-5, rtol=1e-5)

    print("KERNEL_OK")
</pallas_src>

<mosaic_0001>
module attributes {stable_mosaic.version = 11 : i64} {
  func.func @_layernorm_kernel(%arg0: i32, %arg1: memref<16x128xf32, #tpu.memory_space<vmem>>, %arg2: memref<1x128xf32, #tpu.memory_space<vmem>>, %arg3: memref<1x128xf32, #tpu.memory_space<vmem>>, %arg4: memref<16x128xf32, #tpu.memory_space<vmem>>) attributes {dimension_semantics = [#tpu.dimension_semantics<parallel>], iteration_bounds = array<i64: 1>, scalar_prefetch = 0 : i64, scratch_operands = 0 : i64, tpu.core_type = #tpu.core_type<tc>, window_params = [{transform_indices = @transform_0, window_bounds = array<i64: 16, 128>}, {pipeline_mode = #tpu.pipeline_mode<synchronous>, transform_indices = @transform_1, window_bounds = array<i64: 1, 128>}, {pipeline_mode = #tpu.pipeline_mode<synchronous>, transform_indices = @transform_2, window_bounds = array<i64: 1, 128>}, {transform_indices = @transform_3, window_bounds = array<i64: 16, 128>}]} {
    %c0 = arith.constant 0 : index
    %c0_0 = arith.constant 0 : index
    %0 = vector.load %arg1[%c0, %c0_0] : memref<16x128xf32, #tpu.memory_space<vmem>>, vector<16x128xf32>
    %1 = tpu.iota {dimensions = array<i32: 1>} : vector<16x128xi32>
    %c32_i32 = arith.constant 32 : i32
    %2 = vector.broadcast %c32_i32 : i32 to vector<16x128xi32>
    %3 = arith.cmpi slt, %1, %2 : vector<16x128xi32>
    %cst = arith.constant 0.000000e+00 : f32
    %4 = vector.broadcast %cst : f32 to vector<16x128xf32>
    %5 = arith.select %3, %0, %4 : vector<16x128xi1>, vector<16x128xf32>
    %cst_1 = arith.constant dense<0.000000e+00> : vector<16xf32>
    %6 = vector.multi_reduction <add>, %5, %cst_1 [1] : vector<16x128xf32> to vector<16xf32>
    %7 = vector.shape_cast %6 : vector<16xf32> to vector<16x1xf32>
    %cst_2 = arith.constant 3.125000e-02 : f32
    %8 = vector.broadcast %cst_2 : f32 to vector<16x1xf32>
    %9 = arith.mulf %7, %8 : vector<16x1xf32>
    %10 = vector.broadcast %9 : vector<16x1xf32> to vector<16x128xf32>
    %11 = arith.subf %0, %10 : vector<16x128xf32>
    %cst_3 = arith.constant 0.000000e+00 : f32
    %12 = vector.broadcast %cst_3 : f32 to vector<16x128xf32>
    %13 = arith.select %3, %11, %12 : vector<16x128xi1>, vector<16x128xf32>
    %14 = arith.mulf %13, %13 : vector<16x128xf32>
    %cst_4 = arith.constant dense<0.000000e+00> : vector<16xf32>
    %15 = vector.multi_reduction <add>, %14, %cst_4 [1] : vector<16x128xf32> to vector<16xf32>
    %16 = vector.shape_cast %15 : vector<16xf32> to vector<16x1xf32>
    %cst_5 = arith.constant 3.125000e-02 : f32
    %17 = vector.broadcast %cst_5 : f32 to vector<16x1xf32>
    %18 = arith.mulf %16, %17 : vector<16x1xf32>
    %cst_6 = arith.constant 9.99999974E-6 : f32
    %19 = vector.broadcast %cst_6 : f32 to vector<16x1xf32>
    %20 = arith.addf %18, %19 : vector<16x1xf32>
    %21 = math.rsqrt %20 : vector<16x1xf32>
    %22 = vector.broadcast %21 : vector<16x1xf32> to vector<16x128xf32>
    %23 = arith.mulf %13, %22 : vector<16x128xf32>
    %c0_7 = arith.constant 0 : index
    %c0_8 = arith.constant 0 : index
    %24 = vector.load %arg2[%c0_7, %c0_8] : memref<1x128xf32, #tpu.memory_space<vmem>>, vector<1x128xf32>
    %25 = vector.broadcast %24 : vector<1x128xf32> to vector<16x128xf32>
    %26 = arith.mulf %23, %25 : vector<16x128xf32>
    %c0_9 = arith.constant 0 : index
    %c0_10 = arith.constant 0 : index
    %27 = vector.load %arg3[%c0_9, %c0_10] : memref<1x128xf32, #tpu.memory_space<vmem>>, vector<1x128xf32>
    %28 = vector.broadcast %27 : vector<1x128xf32> to vector<16x128xf32>
    %29 = arith.addf %26, %28 : vector<16x128xf32>
    %c0_11 = arith.constant 0 : index
    %c0_12 = arith.constant 0 : index
    %30 = vector.load %arg4[%c0_11, %c0_12] : memref<16x128xf32, #tpu.memory_space<vmem>>, vector<16x128xf32>
    tpu.vector_store %arg4[%c0_11, %c0_12], %29 {strides = array<i32>} : memref<16x128xf32, #tpu.memory_space<vmem>>, vector<16x128xf32>,
    return
  }
  func.func @transform_0(%arg0: i32) -> (i32, i32) {
    %c0_i32 = arith.constant 0 : i32
    %c0_i32_0 = arith.constant 0 : i32
    return %arg0, %c0_i32 : i32, i32
  }
  func.func @transform_1(%arg0: i32) -> (i32, i32) {
    %c0_i32 = arith.constant 0 : i32
    %c0_i32_0 = arith.constant 0 : i32
    %c0_i32_1 = arith.constant 0 : i32
    return %c0_i32, %c0_i32_0 : i32, i32
  }
  func.func @transform_2(%arg0: i32) -> (i32, i32) {
    %c0_i32 = arith.constant 0 : i32
    %c0_i32_0 = arith.constant 0 : i32
    %c0_i32_1 = arith.constant 0 : i32
    return %c0_i32, %c0_i32_0 : i32, i32
  }
  func.func @transform_3(%arg0: i32) -> (i32, i32) {
    %c0_i32 = arith.constant 0 : i32
    %c0_i32_0 = arith.constant 0 : i32
    return %arg0, %c0_i32 : i32, i32
  }
}

</mosaic_0001>

<bundles_post_ra>
// kernel: tpu_custom_call.1
= control target key start
LH: loop header
LB: loop body
LE: loop exit
PB: predicated region body
PF: predicated region fallthrough
CT: control target
= control target key end

     0   :  { %8 = vsyncpa [#allocation3], 0  ;;  %s219_s0 = inlined_call_operand.hbm [shape: f32[16,128], index: 0, kind: input, shape index: {}]   ;;  %s220_s1 = inlined_call_operand.vmem [shape: f32[1,128], index: 1, kind: input, shape index: {}]   ;;  %s221_s2 = inlined_call_operand.vmem [shape: f32[1,128], index: 2, kind: input, shape index: {}]   ;;  %s222_s3 = inlined_call_operand.hbm [shape: f32[16,128], index: 3, kind: output, shape index: {}]  }
   0x1   :  { %9 = vsyncpa [#allocation4], 0  ;;  %s155_s12 = smov [#allocation2]   ;;  %s107_s16 = scalar_lea.hbm %s219_s0, 256 }
   0x2   :  { %s15_s13 = sshll.u32 %s155_s12, 4  ;;  %p108_p0 = scmp.ne.s32.totalorder %s219_s0, %s107_s16  ;;  %s16_s13 = int_to_ptr.vmem [resolvable:$true] %s15_s13 }
   0x3   :  { %p111_p1 = scmp.lt.u32.totalorder %s107_s16, %s219_s0 }
   0x5   :  { %p113_p2 = pnand %p111_p1, %p108_p0 }
   0x7   :  { %116 = shalt.err (!%p113_p2)
}
   0x8   :  { %s117_s21 = scalar_lea.vmem %s16_s13, 256  ;;  %p122_p4 = scmp.lt.s32.totalorder %s16_s13, %s16_s13 }
   0x9   :  { %p118_p3 = scmp.ne.s32.totalorder %s16_s13, %s117_s21  ;;  %p123_p5 = scmp.lt.s32.totalorder %s117_s21, %s117_s21 }
   0xb   :  { %p124_p6 = por %p123_p5, %p122_p4 }
   0xd   :  { %p125_p7 = pnand %p124_p6, %p118_p3 }
   0xf   :  { %128 = shalt.err (!%p125_p7)
}
  0x10   :  { %s156_s22 = smov 128   ;;  %s157_s23 = smov 8  }
  0x11   :  { %21 = dma.hbm_to_vmem [thread:$0]  %s219_s0, 256, %s16_s13, [#allocation3], %s156_s22, %s156_s22, %s157_s23  }
  0x12   :  { %151 = dma.done.wait [#allocation3], 256  }
  0x13   :  { %152 = vsyncadd [#allocation3], 4294967040  ;;  %v31_v0 = vlaneseq  ;;  %v29_v2 = vld [vmem:[#allocation2] sm:$0xff]  ;;  %v30_v3 = vld [vmem:[#allocation2 + $0x8] sm:$0xff]  ;;  %s158_s29 = smov [#allocation5]  }
  0x14   :  { %v97_v23 = vld [vmem:[%s220_s1] ss:$0 sm:$0xff]  ;;  %s85_s30 = sshll.u32 %s158_s29, 4  ;;  %s86_s30 = int_to_ptr.vmem [resolvable:$true] %s85_s30 }
  0x15   :  { %v32_v1 = vand.u32 127, %v31_v0  ;;  %v98_v25 = vld [vmem:[%s221_s2] ss:$0 sm:$0xff]  ;;  %s129_s4 = scalar_lea.vmem %s86_s30, 256  ;;  %p134_p9 = scmp.lt.s32.totalorder %s86_s30, %s86_s30 }
  0x16   :  { %p130_p8 = scmp.ne.s32.totalorder %s86_s30, %s129_s4  ;;  %p135_p10 = scmp.lt.s32.totalorder %s129_s4, %s129_s4 }
  0x17   :  { %vm33_vm0 = vcmp.lt.s32.totalorder %v32_v1, 32 }
  0x18   :  { %v34_v4 = vsel %vm33_vm0, %v29_v2, 0.0  ;;  %v35_v5 = vsel %vm33_vm0, %v30_v3, 0.0  ;;  %p136_p11 = por %p135_p10, %p134_p9 }
  0x19   :  { %36 = vadd.xlane.f32.xlu0 %v34_v4 }
  0x1a   :  { %p137_p12 = pnand %p136_p11, %p130_p8 }
  0x1d   :  { %38 = vadd.xlane.f32.xlu0 %v35_v5 }
  0xa6   :  { %v37_v6 = vpop.xlane.xlu0 %36 }
  0xa7   :  { %v40_v7 = vmul.f32 0.03125, %v37_v6 }
  0xa9   :  { %v42_v8 = vsub.f32 %v29_v2, %v40_v7 }
  0xaa   :  { %v39_v9 = vpop.xlane.xlu0 %38 }
  0xab   :  { %v41_v10 = vmul.f32 0.03125, %v39_v9  ;;  %v44_v11 = vsel %vm33_vm0, %v42_v8, 0.0 }
  0xac   :  { %v46_v12 = vmul.f32 %v44_v11, %v44_v11 }
  0xad   :  { %v43_v13 = vsub.f32 %v30_v3, %v41_v10 }
  0xae   :  { %48 = vadd.xlane.f32.xlu1 %v46_v12 }
  0xaf   :  { %v45_v14 = vsel %vm33_vm0, %v43_v13, 0.0 }
  0xb0   :  { %v47_v15 = vmul.f32 %v45_v14, %v45_v14 }
  0xb2   :  { %50 = vadd.xlane.f32.xlu1 %v47_v15 }
 0x13b   :  { %v49_v16 = vpop.xlane.xlu1 %48 }
 0x13c   :  { %v52_v17 = vmul.f32 0.03125, %v49_v16 }
 0x13e   :  { %v54_v18 = vadd.f32 1e-05, %v52_v17 }
 0x13f   :  { %v51_v19 = vpop.xlane.xlu1 %50 }
 0x140   :  { %103 = vrsqrt.f32 %v54_v18  ;;  %v53_v20 = vmul.f32 0.03125, %v51_v19 }
 0x142   :  { %v55_v21 = vadd.f32 1e-05, %v53_v20 }
 0x144   :  { %105 = vrsqrt.f32 %v55_v21 }
 0x14a   :  { %v104_v22 = vpop.eup %103 }
 0x14b   :  { %v58_v24 = vmul.f32 %v104_v22, %v44_v11 }
 0x14d   :  { %v67_v26 = vmul.f32 %v97_v23, %v58_v24 }
 0x14e   :  { %v106_v27 = vpop.eup %105 }
 0x14f   :  { %v59_v28 = vmul.f32 %v106_v27, %v45_v14  ;;  %v76_v29 = vadd.f32 %v98_v25, %v67_v26 }
 0x151   :  { %v68_v30 = vmul.f32 %v97_v23, %v59_v28  ;;  %78 = vst [vmem:[#allocation5] sm:$0xff] %v76_v29 }
 0x153   :  { %v77_v31 = vadd.f32 %v98_v25, %v68_v30 }
 0x155   :  { %79 = vst [vmem:[#allocation5 + $0x8] sm:$0xff] %v77_v31 }
 0x156   :  { %140 = shalt.err (!%p137_p12)
}
 0x157   :  { %s141_s5 = scalar_lea.hbm %s222_s3, 256 }
 0x158   :  { %p142_p13 = scmp.ne.s32.totalorder %s222_s3, %s141_s5  ;;  %p145_p0 = scmp.lt.u32.totalorder %s141_s5, %s222_s3 }
 0x15a   :  { %p147_p1 = pnand %p145_p0, %p142_p13 }
 0x15c   :  { %150 = shalt.err (!%p147_p1)
}
 0x15d   :  { %91 = dma.vmem_to_hbm [thread:$0]  %s86_s30, 256, %s222_s3, [#allocation4], %s156_s22, %s156_s22, %s157_s23  }
 0x15e   :  { %153 = dma.done.wait [#allocation4], 256  }
 0x15f   :  { %154 = vsyncadd [#allocation4], 4294967040 }
 0x160   :  { %95 = vsyncpa [#allocation3], 1 }
 0x161   :  { %96 = vsyncpa [#allocation4], 1 }

</bundles_post_ra>
